<compile_context>
chip_gen: v7x
topology: tpu7x:2x2x1
jax: 0.10.0
libtpu: 0.0.40
codegen_flags: <defaults>
</compile_context>

<pallas_src>
import functools

import jax
import jax.numpy as jnp
from jax.experimental import pallas as pl
from jax.experimental.pallas import tpu as pltpu


def _round_up(a: int, b: int) -> int:
    return ((a + b - 1) // b) * b


def _pad2d(a, rows, cols):
    r, c = a.shape
    if r == rows and c == cols:
        return a
    return jnp.pad(a, ((0, rows - r), (0, cols - c)))


# ----------------------------------------------------------------------------
# Kernel bodies
# ----------------------------------------------------------------------------
def bf16_linear_kernel_single(x_ref, w_ref, b_ref, o_ref):
    """Whole K in one tile: no scratch accumulator, 2-D grid (i, j)."""
    # X = X.to(torch.bfloat16) (activation cast kept in-kernel; x is f32 in HBM)
    x_bf16 = x_ref[...].astype(jnp.bfloat16)
    acc = jnp.dot(x_bf16, w_ref[...], preferred_element_type=jnp.float32)
    # Bias in f32 epilogue, single bf16 rounding, then .float() -> f32 output.
    y = acc + b_ref[...].astype(jnp.float32)
    o_ref[...] = y.astype(jnp.bfloat16).astype(jnp.float32)


def bf16_linear_kernel_acc(x_ref, w_ref, b_ref, o_ref, acc_ref):
    """K streamed along grid axis 2; f32 VMEM accumulator per (tm, tn) tile."""
    k = pl.program_id(2)

    @pl.when(k == 0)
    def _init():
        # Fold the bias into the accumulator init (read once per (i, j) tile).
        acc_ref[...] = jnp.broadcast_to(
            b_ref[...].astype(jnp.float32), acc_ref.shape)

    x_bf16 = x_ref[...].astype(jnp.bfloat16)
    acc_ref[...] += jnp.dot(x_bf16, w_ref[...],
                            preferred_element_type=jnp.float32)

    @pl.when(k == pl.num_programs(2) - 1)
    def _finalize():
        # Single bf16 rounding, then X.float() -> f32 output.
        o_ref[...] = acc_ref[...].astype(jnp.bfloat16).astype(jnp.float32)


# ----------------------------------------------------------------------------
# Param preparation ( `self.module.bfloat16()` done once, cached )
# ----------------------------------------------------------------------------
def prepare_bf16_params(weight_f32, bias_f32):
    """weight_f32: [out_features, in_features] (torch layout); bias_f32: [out].

    Returns (w_t_bf16 [in, out], bias_bf16 [1, out]).
    """
    w_t_bf16 = weight_f32.T.astype(jnp.bfloat16)
    b_bf16 = bias_f32.astype(jnp.bfloat16).reshape(1, -1)
    return w_t_bf16, b_bf16


# ----------------------------------------------------------------------------
# Forward
# ----------------------------------------------------------------------------
@functools.partial(jax.jit, static_argnames=("tm_target", "tn_target", "tk_target"))
def bf16_module_wrapper_forward(x, w_t_bf16, b_bf16,
                                tm_target=512, tn_target=512, tk_target=512):
    """x: f32 [B, S, H]; w_t_bf16: bf16 [H, out]; b_bf16: bf16 [1, out]."""
    B, S, H = x.shape
    in_f, out_f = w_t_bf16.shape
    assert in_f == H

    M = B * S
    x2d = x.reshape(M, H)

    # Tile sizes: lane axis multiples of 128, sublane multiples of 8 (f32
    # activations / output); capped by the (padded) problem size so small
    # shapes still run.
    tm = min(tm_target, _round_up(M, 8))        # f32 x / f32 out sublane
    tk = min(tk_target, _round_up(H, 128))      # x lane dim & bf16 w sublane
    tn = min(tn_target, _round_up(out_f, 128))  # lane-dense output stores

    M_pad = _round_up(M, tm)
    K_pad = _round_up(H, tk)
    N_pad = _round_up(out_f, tn)

    # Zero-pad to tile multiples only when needed (zeros contribute nothing).
    x_p = _pad2d(x2d, M_pad, K_pad)
    w_p = _pad2d(w_t_bf16, K_pad, N_pad)
    b_p = _pad2d(b_bf16, 1, N_pad)

    grid_m = M_pad // tm
    grid_n = N_pad // tn
    grid_k = K_pad // tk

    cost = pl.CostEstimate(
        flops=2 * M_pad * K_pad * N_pad,
        transcendentals=0,
        bytes_accessed=(4 * M_pad * K_pad        # f32 activations
                        + 2 * K_pad * N_pad      # bf16 weight
                        + 2 * N_pad              # bf16 bias
                        + 4 * M_pad * N_pad),    # f32 output
    )

    if grid_k == 1:
        # Fast path: whole K in one pass, no scratch accumulator, 2-D grid.
        grid_spec = pltpu.PrefetchScalarGridSpec(
            num_scalar_prefetch=0,
            grid=(grid_m, grid_n),
            in_specs=[
                pl.BlockSpec((tm, K_pad), lambda i, j: (i, 0)),   # activations
                pl.BlockSpec((K_pad, tn), lambda i, j: (0, j)),   # bf16 weight
                pl.BlockSpec((1, tn), lambda i, j: (0, j)),       # bf16 bias
            ],
            out_specs=pl.BlockSpec((tm, tn), lambda i, j: (i, j)),
        )
        out_p = pl.pallas_call(
            bf16_linear_kernel_single,
            out_shape=jax.ShapeDtypeStruct((M_pad, N_pad), jnp.float32),
            grid_spec=grid_spec,
            compiler_params=pltpu.CompilerParams(
                dimension_semantics=("parallel", "parallel"),
                vmem_limit_bytes=64 * 1024 * 1024,
            ),
            cost_estimate=cost,
        )(x_p, w_p, b_p)
    else:
        grid_spec = pltpu.PrefetchScalarGridSpec(
            num_scalar_prefetch=0,
            grid=(grid_m, grid_n, grid_k),
            in_specs=[
                pl.BlockSpec((tm, tk), lambda i, j, k: (i, k)),   # activations
                pl.BlockSpec((tk, tn), lambda i, j, k: (k, j)),   # bf16 weight
                pl.BlockSpec((1, tn), lambda i, j, k: (0, j)),    # bf16 bias
            ],
            out_specs=pl.BlockSpec((tm, tn), lambda i, j, k: (i, j)),
            scratch_shapes=[pltpu.VMEM((tm, tn), jnp.float32)],   # f32 accumulator
        )
        out_p = pl.pallas_call(
            bf16_linear_kernel_acc,
            out_shape=jax.ShapeDtypeStruct((M_pad, N_pad), jnp.float32),
            grid_spec=grid_spec,
            compiler_params=pltpu.CompilerParams(
                dimension_semantics=("parallel", "parallel", "arbitrary"),
                vmem_limit_bytes=64 * 1024 * 1024,
            ),
            cost_estimate=cost,
        )(x_p, w_p, b_p)

    return out_p[:M, :out_f].reshape(B, S, out_f)


# ----------------------------------------------------------------------------
# Reference (pure JAX): bf16 matmul, f32 accumulation, bias in f32 epilogue,
# single bf16 rounding, then .float().
# ----------------------------------------------------------------------------
def _reference(x, weight, bias):
    B, S, H = x.shape
    out_f = weight.shape[0]
    acc = jnp.dot(
        x.astype(jnp.bfloat16).reshape(B * S, H),
        weight.T.astype(jnp.bfloat16),
        preferred_element_type=jnp.float32,
    )
    y = (acc + bias.astype(jnp.bfloat16).astype(jnp.float32))
    return y.astype(jnp.bfloat16).astype(jnp.float32).reshape(B, S, out_f)


if __name__ == "__main__":
    key = jax.random.PRNGKey(0)

    # --- Test 1: small nn.Linear(hidden, hidden), single-K-pass path --------
    B, S, H = 2, 8, 32
    k1, k2, k3, key = jax.random.split(key, 4)
    x = jax.random.normal(k1, (B, S, H), dtype=jnp.float32)
    weight = jax.random.normal(k2, (H, H), dtype=jnp.float32) * 0.1  # torch [out, in]
    bias = jax.random.normal(k3, (H,), dtype=jnp.float32) * 0.1

    w_t_bf16, b_bf16 = prepare_bf16_params(weight, bias)
    y = bf16_module_wrapper_forward(x, w_t_bf16, b_bf16)
    y = jax.block_until_ready(y)
    assert y.dtype == jnp.float32
    ref = _reference(x, weight, bias)
    assert jnp.allclose(y, ref, atol=1e-2, rtol=1e-2), float(
        jnp.max(jnp.abs(y - ref)))

    # --- Test 2: K streamed across the grid (accumulator path) --------------
    B2, S2, H2, O2 = 2, 8, 256, 160
    k4, k5, k6, key = jax.random.split(key, 4)
    x2 = jax.random.normal(k4, (B2, S2, H2), dtype=jnp.float32)
    weight2 = jax.random.normal(k5, (O2, H2), dtype=jnp.float32) * 0.05
    bias2 = jax.random.normal(k6, (O2,), dtype=jnp.float32) * 0.05

    w2_t_bf16, b2_bf16 = prepare_bf16_params(weight2, bias2)
    y2 = bf16_module_wrapper_forward(x2, w2_t_bf16, b2_bf16, tk_target=128)
    y2 = jax.block_until_ready(y2)
    assert y2.dtype == jnp.float32
    ref2 = _reference(x2, weight2, bias2)
    assert jnp.allclose(y2, ref2, atol=1e-2, rtol=1e-2), float(
        jnp.max(jnp.abs(y2 - ref2)))

    print("KERNEL_OK")
</pallas_src>

<mosaic_0001>
module attributes {stable_mosaic.version = 11 : i64} {
  func.func @bf16_linear_kernel_single(%arg0: i32, %arg1: i32, %arg2: memref<16x128xf32, #tpu.memory_space<vmem>>, %arg3: memref<128x128xbf16, #tpu.memory_space<vmem>>, %arg4: memref<1x128xbf16, #tpu.memory_space<vmem>>, %arg5: memref<16x128xf32, #tpu.memory_space<vmem>>) attributes {dimension_semantics = [#tpu.dimension_semantics<parallel>, #tpu.dimension_semantics<parallel>], iteration_bounds = array<i64: 1, 1>, scalar_prefetch = 0 : i64, scratch_operands = 0 : i64, tpu.core_type = #tpu.core_type<tc>, window_params = [{transform_indices = @transform_0, window_bounds = array<i64: 16, 128>}, {transform_indices = @transform_1, window_bounds = array<i64: 128, 128>}, {transform_indices = @transform_2, window_bounds = array<i64: 1, 128>}, {transform_indices = @transform_3, window_bounds = array<i64: 16, 128>}]} {
    %c0 = arith.constant 0 : index
    %c0_0 = arith.constant 0 : index
    %0 = vector.load %arg2[%c0, %c0_0] : memref<16x128xf32, #tpu.memory_space<vmem>>, vector<16x128xf32>
    %1 = arith.truncf %0 : vector<16x128xf32> to vector<16x128xbf16>
    %c0_1 = arith.constant 0 : index
    %c0_2 = arith.constant 0 : index
    %2 = vector.load %arg3[%c0_1, %c0_2] : memref<128x128xbf16, #tpu.memory_space<vmem>>, vector<128x128xbf16>
    %cst = arith.constant dense<0.000000e+00> : vector<16x128xf32>
    %3 = tpu.matmul %1, %2, %cst {dimension_numbers = #tpu.dot_dimension_numbers<[1], [0], [0], [1], [0, 0, 1, 1], [], []>} : vector<16x128xbf16>, vector<128x128xbf16>, vector<16x128xf32> -> vector<16x128xf32>
    %c0_3 = arith.constant 0 : index
    %c0_4 = arith.constant 0 : index
    %4 = vector.load %arg4[%c0_3, %c0_4] : memref<1x128xbf16, #tpu.memory_space<vmem>>, vector<1x128xbf16>
    %5 = arith.extf %4 : vector<1x128xbf16> to vector<1x128xf32>
    %6 = vector.broadcast %5 : vector<1x128xf32> to vector<16x128xf32>
    %7 = arith.addf %3, %6 : vector<16x128xf32>
    %8 = arith.truncf %7 : vector<16x128xf32> to vector<16x128xbf16>
    %9 = arith.extf %8 : vector<16x128xbf16> to vector<16x128xf32>
    %c0_5 = arith.constant 0 : index
    %c0_6 = arith.constant 0 : index
    %10 = vector.load %arg5[%c0_5, %c0_6] : memref<16x128xf32, #tpu.memory_space<vmem>>, vector<16x128xf32>
    tpu.vector_store %arg5[%c0_5, %c0_6], %9 {strides = array<i32>} : memref<16x128xf32, #tpu.memory_space<vmem>>, vector<16x128xf32>,
    return
  }
  func.func @transform_0(%arg0: i32, %arg1: i32) -> (i32, i32) {
    %c0_i32 = arith.constant 0 : i32
    %c0_i32_0 = arith.constant 0 : i32
    return %arg0, %c0_i32 : i32, i32
  }
  func.func @transform_1(%arg0: i32, %arg1: i32) -> (i32, i32) {
    %c0_i32 = arith.constant 0 : i32
    %c0_i32_0 = arith.constant 0 : i32
    return %c0_i32, %arg1 : i32, i32
  }
  func.func @transform_2(%arg0: i32, %arg1: i32) -> (i32, i32) {
    %c0_i32 = arith.constant 0 : i32
    %c0_i32_0 = arith.constant 0 : i32
    return %c0_i32, %arg1 : i32, i32
  }
  func.func @transform_3(%arg0: i32, %arg1: i32) -> (i32, i32) {
    %c0_i32 = arith.constant 0 : i32
    return %arg0, %arg1 : i32, i32
  }
}

</mosaic_0001>

<bundles_post_ra>
// kernel: bf16_module_wrapper_forward.1
= control target key start
LH: loop header
LB: loop body
LE: loop exit
PB: predicated region body
PF: predicated region fallthrough
CT: control target
= control target key end

     0   :  { %8 = vsyncpa [#allocation3], 0  ;;  %s425_s0 = inlined_call_operand.hbm [shape: f32[16,128], index: 0, kind: input, shape index: {}]   ;;  %s426_s1 = inlined_call_operand.hbm [shape: bf16[128,128], index: 1, kind: input, shape index: {}]   ;;  %s427_s2 = inlined_call_operand.hbm [shape: bf16[1,128], index: 2, kind: input, shape index: {}]   ;;  %s428_s3 = inlined_call_operand.hbm [shape: f32[16,128], index: 3, kind: output, shape index: {}]  }
   0x1   :  { %9 = vsyncpa [#allocation6], 0 }
   0x2   :  { %10 = vsyncpa [#allocation4], 0  ;;  %s341_s12 = smov [#allocation5]   ;;  %s247_s16 = scalar_lea.hbm %s426_s1, 1024 }
   0x3   :  { %s28_s13 = sshll.u32 %s341_s12, 4  ;;  %p248_p0 = scmp.ne.s32.totalorder %s426_s1, %s247_s16  ;;  %s29_s13 = int_to_ptr.vmem [resolvable:$true] %s28_s13 }
   0x4   :  { %p251_p1 = scmp.lt.u32.totalorder %s247_s16, %s426_s1 }
   0x6   :  { %p253_p2 = pnand %p251_p1, %p248_p0 }
   0x8   :  { %256 = shalt.err (!%p253_p2)
}
   0x9   :  { %s257_s21 = scalar_lea.vmem %s29_s13, 1024  ;;  %p262_p4 = scmp.lt.s32.totalorder %s29_s13, %s29_s13 }
   0xa   :  { %p258_p3 = scmp.ne.s32.totalorder %s29_s13, %s257_s21  ;;  %p263_p5 = scmp.lt.s32.totalorder %s257_s21, %s257_s21 }
   0xc   :  { %p264_p6 = por %p263_p5, %p262_p4 }
   0xe   :  { %p265_p7 = pnand %p264_p6, %p258_p3 }
  0x10   :  { %268 = shalt.err (!%p265_p7)
}
  0x11   :  { %s342_s22 = smov 64   ;;  %s343_s23 = smov 4  }
  0x12   :  { %34 = dma.hbm_to_vmem [thread:$0]  %s426_s1, 1024, %s29_s13, [#allocation6], %s342_s22, %s342_s22, %s343_s23  }
  0x13   :  { %s344_s26 = smov [#allocation2]   ;;  %s269_s30 = scalar_lea.hbm %s425_s0, 256 }
  0x14   :  { %s16_s27 = sshll.u32 %s344_s26, 4  ;;  %p270_p8 = scmp.ne.s32.totalorder %s425_s0, %s269_s30  ;;  %s17_s27 = int_to_ptr.vmem [resolvable:$true] %s16_s27 }
  0x15   :  { %p273_p9 = scmp.lt.u32.totalorder %s269_s30, %s425_s0 }
  0x17   :  { %p275_p10 = pnand %p273_p9, %p270_p8 }
  0x19   :  { %278 = shalt.err (!%p275_p10)
}
  0x1a   :  { %s279_s8 = scalar_lea.vmem %s17_s27, 256  ;;  %p284_p12 = scmp.lt.s32.totalorder %s17_s27, %s17_s27 }
  0x1b   :  { %p280_p11 = scmp.ne.s32.totalorder %s17_s27, %s279_s8  ;;  %p285_p13 = scmp.lt.s32.totalorder %s279_s8, %s279_s8 }
  0x1d   :  { %p286_p0 = por %p285_p13, %p284_p12 }
  0x1f   :  { %p287_p1 = pnand %p286_p0, %p280_p11 }
  0x21   :  { %290 = shalt.err (!%p287_p1)
}
  0x22   :  { %s345_s1 = smov 128   ;;  %s346_s9 = smov 8  }
  0x23   :  { %22 = dma.hbm_to_vmem [thread:$0]  %s425_s0, 256, %s17_s27, [#allocation3], %s345_s1, %s345_s1, %s346_s9  }
  0x24   :  { %s347_s12 = smov [#allocation7]   ;;  %s291_s16 = scalar_lea.hbm %s427_s2, 16 }
  0x25   :  { %s41_s13 = sshll.u32 %s347_s12, 4  ;;  %p292_p2 = scmp.ne.s32.totalorder %s427_s2, %s291_s16  ;;  %s42_s13 = int_to_ptr.vmem [resolvable:$true] %s41_s13 }
  0x26   :  { %p295_p3 = scmp.lt.u32.totalorder %s291_s16, %s427_s2 }
  0x28   :  { %p297_p4 = pnand %p295_p3, %p292_p2 }
  0x2a   :  { %300 = shalt.err (!%p297_p4)
}
  0x2b   :  { %s301_s21 = scalar_lea.vmem %s42_s13, 16  ;;  %s305_s0 = scalar_lea.vmem %s42_s13, 32 }
  0x2c   :  { %p302_p5 = scmp.ne.s32.totalorder %s42_s13, %s301_s21  ;;  %p306_p6 = scmp.lt.s32.totalorder %s42_s13, %s42_s13 }
  0x2d   :  { %p307_p7 = scmp.lt.s32.totalorder %s305_s0, %s301_s21 }
  0x2f   :  { %p308_p8 = por %p307_p7, %p306_p6 }
  0x31   :  { %p309_p9 = pnand %p308_p8, %p302_p5 }
  0x33   :  { %312 = shalt.err (!%p309_p9)
}
  0x34   :  { %44 = dma.hbm_to_vmem [thread:$0]  %s427_s2, 16, %s42_s13, [#allocation6]  }
  0x35   :  { %335 = dma.done.wait [#allocation3], 256  }
  0x36   :  { %336 = vsyncadd [#allocation3], 4294967040 }
  0x37   :  { %337 = dma.done.wait [#allocation6], 1040  }
  0x38   :  { %338 = vsyncadd [#allocation6], 4294966256  ;;  %v348_v0 = vmov 0.0   ;;  %vm349_vm0 = vmmov 0   ;;  %v239_v1 = vld [vmem:[#allocation5] sm:$0xff]   ;;  %v240_v2 = vld [vmem:[#allocation5 + $0x8] sm:$0xff]   ;;  %v76_v12 = vlaneseq }
  0x39   :  { %209 = vmatprep.subr.bf16.mxu0 %v348_v0  ;;  %225 = vmatprep.mubr.msk.bf16.mxu0 %vm349_vm0, %v348_v0  ;;  %v241_v3 = vld [vmem:[#allocation5 + $0x10] sm:$0xff]   ;;  %v242_v4 = vld [vmem:[#allocation5 + $0x18] sm:$0xff]   ;;  %v243_v5 = vld [vmem:[#allocation5 + $0x20] sm:$0xff]   ;;  %s350_s2 = smov [#allocation8]  }
  0x3a   :  { %210 = vmatpush3.bf16.msra.mxu0 %v239_v1  ;;  %v244_v6 = vld [vmem:[#allocation5 + $0x28] sm:$0xff]   ;;  %v245_v7 = vld [vmem:[#allocation5 + $0x30] sm:$0xff]   ;;  %v246_v8 = vld [vmem:[#allocation5 + $0x38] sm:$0xff]   ;;  %v77_v13 = vshrl.u32 %v76_v12, 7  ;;  %s179_s24 = sshll.u32 %s350_s2, 4  ;;  %s180_s24 = int_to_ptr.vmem [resolvable:$true] %s179_s24 }
  0x3b   :  { %211 = vmatprep.subr.bf16.mxu0 %v348_v0  ;;  %v55_v9 = vld [vmem:[#allocation2] sm:$0xff]  ;;  %v56_v10 = vld [vmem:[#allocation2 + $0x8] sm:$0xff]  ;;  %v74_v14 = vld [vmem:[#allocation7] sm:$0x1]  ;;  %s313_s25 = scalar_lea.vmem %s180_s24, 256  ;;  %p318_p11 = scmp.lt.s32.totalorder %s180_s24, %s180_s24 }
  0x3c   :  { %v57_v11 = vpack.c.bf16 %v56_v10, %v55_v9  ;;  %v75_v15 = vunpack.c.l.bf16 %v74_v14  ;;  %v78_v16 = vsub.s32 0, %v77_v13  ;;  %p314_p10 = scmp.ne.s32.totalorder %s180_s24, %s313_s25  ;;  %p319_p12 = scmp.lt.s32.totalorder %s313_s25, %s313_s25 }
  0x3e   :  { %212 = vmatpush3.bf16.msra.mxu0 %v240_v2  ;;  %v79_v17 = vrot.slane %v75_v15, %v78_v16  ;;  %p320_p13 = por %p319_p12, %p318_p11 }
  0x3f   :  { %213 = vmatprep.subr.bf16.mxu0 %v348_v0 }
  0x40   :  { %p321_p0 = pnand %p320_p13, %p314_p10 }
  0x42   :  { %214 = vmatpush3.bf16.msra.mxu0 %v241_v3 }
  0x43   :  { %215 = vmatprep.subr.bf16.mxu0 %v348_v0 }
  0x46   :  { %216 = vmatpush3.bf16.msra.mxu0 %v242_v4 }
  0x47   :  { %217 = vmatprep.subr.bf16.mxu0 %v348_v0 }
  0x4a   :  { %218 = vmatpush3.bf16.msra.mxu0 %v243_v5 }
  0x4b   :  { %219 = vmatprep.subr.bf16.mxu0 %v348_v0 }
  0x4e   :  { %220 = vmatpush3.bf16.msra.mxu0 %v244_v6 }
  0x4f   :  { %221 = vmatprep.subr.bf16.mxu0 %v348_v0 }
  0x52   :  { %222 = vmatpush3.bf16.msra.mxu0 %v245_v7 }
  0x53   :  { %223 = vmatprep.subr.bf16.mxu0 %v348_v0 }
  0x56   :  { %224 = vmatpush3.bf16.msra.mxu0 %v246_v8 }
  0x59   :  { %226 = vmatmul.mubr.bf16.vlgmr.msra.gmra.mrb[0].mxu0 %v57_v11 }
 0x12c   :  { %v162_v18 = vpop.f32.mrb[0].mxu0 }
 0x12d   :  { %v227_v19 = vpop.f32.mrb[1].mxu0  ;;  %v163_v21 = vadd.f32 %v162_v18, %v79_v17 }
 0x12e   :  { %v165_v20 = vpop.f32.mrb[2].mxu0 }
 0x12f   :  { %v166_v22 = vadd.f32 %v165_v20, %v79_v17  ;;  %v228_v23 = vpop.f32.mrb[3].mxu0 }
 0x131   :  { %v169_v24 = vpack.c.bf16 %v166_v22, %v163_v21 }
 0x133   :  { %v170_v25 = vunpack.c.l.bf16 %v169_v24  ;;  %v171_v26 = vunpack.c.h.bf16 %v169_v24 }
 0x135   :  { %172 = vst [vmem:[#allocation8] sm:$0xff] %v170_v25  ;;  %173 = vst [vmem:[#allocation8 + $0x8] sm:$0xff] %v171_v26 }
 0x136   :  { %324 = shalt.err (!%p321_p0)
}
 0x137   :  { %s325_s28 = scalar_lea.hbm %s428_s3, 256 }
 0x138   :  { %p326_p1 = scmp.ne.s32.totalorder %s428_s3, %s325_s28  ;;  %p329_p2 = scmp.lt.u32.totalorder %s325_s28, %s428_s3 }
 0x13a   :  { %p331_p3 = pnand %p329_p2, %p326_p1 }
 0x13c   :  { %334 = shalt.err (!%p331_p3)
}
 0x13d   :  { %185 = dma.vmem_to_hbm [thread:$0]  %s180_s24, 256, %s428_s3, [#allocation4], %s345_s1, %s345_s1, %s346_s9  }
 0x13e   :  { %339 = dma.done.wait [#allocation4], 256  }
 0x13f   :  { %340 = vsyncadd [#allocation4], 4294967040 }
 0x140   :  { %189 = vsyncpa [#allocation3], 1 }
 0x141   :  { %190 = vsyncpa [#allocation6], 1 }
 0x142   :  { %191 = vsyncpa [#allocation4], 1 }

</bundles_post_ra>
